<compile_context>
chip_gen: v7x
topology: tpu7x:2x2x1
jax: 0.10.0
libtpu: 0.0.40
codegen_flags: <defaults>
</compile_context>

<pallas_src>
import functools

import jax
import jax.numpy as jnp
from jax.experimental import pallas as pl
from jax.experimental.pallas import tpu as pltpu

BN_EPS = 1e-5
LANE = 128          # lane width: alignment unit and mid-slab margin
BBLK_MAX = 8        # images fused per grid step (vreg-pressure / VMEM cap)


def _round_up(n, m):
    return (n + m - 1) // m * m


def basic_res_block_kernel(xcol_ref, w1d_ref, b1d_ref, w2f_ref, b2f_ref, mask_ref,
                           out_ref, mid_ref, patch2_ref, *, taps):
    """One block of images per grid step; channels on sublanes, flat spatial on lanes.

    xcol_ref   : (1, 9*Cin, Nout)   wrapper-built conv1 im2col (lane-shifted frame copies)
    w1d_ref    : (2*Cp, 9*Cin)      [bn1-folded conv1 ; bnd-folded 1x1 downsample @ centre tap]
    b1d_ref    : (2*Cp, 1)          [b1 ; bd]
    w2f_ref    : (Cp, 9*Cp)         bn2-folded conv2, flattened tap-major
    b2f_ref    : (Cp, 1)
    mask_ref   : (1, Nout)          1.0 on interior frame lanes, 0.0 on ring / slot padding
    out_ref    : (1, Cp, Nout)      relu(bn2(conv2) + identity) over the whole lane window
    mid_ref    : (Cp, Nout+2*LANE)  VMEM slab staging conv1 output (frame window at lane LANE)
    patch2_ref : (9*Cp, Nout)       VMEM im2col slab for conv2
    """
    cp = out_ref.shape[1]
    n_out = out_ref.shape[2]

    # The mid-slab margins are never overwritten -> zero them once.  On later grid steps
    # (or on the second TensorCore under "parallel" semantics) stale margin data is only
    # read into patch2 columns p < 19 or p >= Nout-19, i.e. frame-ring / slot-padding
    # lanes whose outputs the wrapper discards, so skipping the re-zero is safe.
    @pl.when(pl.program_id(0) == 0)
    def _():
        mid_ref[:, pl.ds(0, LANE)] = jnp.zeros((cp, LANE), jnp.float32)
        mid_ref[:, pl.ds(LANE + n_out, LANE)] = jnp.zeros((cp, LANE), jnp.float32)

    # ---- conv1 (+ fused 1x1 downsample) : one MXU push, BN scale pre-folded ----
    acc = jnp.dot(w1d_ref[...], xcol_ref[0], preferred_element_type=jnp.float32)  # (2Cp, Nout)
    b1d = b1d_ref[...]
    h1 = jnp.maximum(acc[:cp] + b1d[:cp], 0.0) * mask_ref[...]   # relu(bn1(conv1)), ring -> 0
    ident = acc[cp:] + b1d[cp:]                                  # bn_d(conv1x1(x))

    # ---- stage h1, build conv2's im2col: 9 sublane-tile-aligned lane-shifted copies ----
    mid_ref[:, pl.ds(LANE, n_out)] = h1
    for t, off in enumerate(taps):
        patch2_ref[pl.ds(cp * t, cp), :] = mid_ref[:, pl.ds(LANE + off, n_out)]

    # ---- conv2 : one MXU push; residual add + relu ----
    acc2 = jnp.dot(w2f_ref[...], patch2_ref[...], preferred_element_type=jnp.float32)
    # TODO(synk): nn.Dropout2d(p=0.3) is identity at inference; training-mode channel
    # dropout (pltpu.prng_*) is intentionally not implemented.
    out_ref[0] = jnp.maximum(acc2 + b2f_ref[...] + ident, 0.0)


def _fold_bn(gamma, beta, mean, var, eps=BN_EPS):
    scale = gamma / jnp.sqrt(var + eps)
    bias = beta - mean * scale
    return scale.astype(jnp.float32), bias.astype(jnp.float32)


def basic_res_conv_block(x_nchw, w1_oihw, bn1, w2_oihw, bn2, wd_oihw, bnd):
    B, Cin, H, W = x_nchw.shape
    Cp = w1_oihw.shape[0]
    Hp, Wp = H + 2, W + 2
    HWp = Hp * Wp
    Mimg = _round_up(HWp, LANE)            # per-image lane slot (frame + alignment pad)
    taps = tuple((dy - 1) * Wp + (dx - 1) for dy in range(3) for dx in range(3))

    # grid sizing: keep >= 2 steps when possible (v7x: 2 TensorCores), Bblk images / step
    bblk = min(max(1, (B + 1) // 2), BBLK_MAX) if B >= 2 else 1
    num_steps = -(-B // bblk)
    b_pad = num_steps * bblk
    n_out = bblk * Mimg

    # ---------------- input prep (layout plumbing, outside the kernel) ----------------
    x = x_nchw.astype(jnp.float32)
    if b_pad > B:
        x = jnp.pad(x, ((0, b_pad - B), (0, 0), (0, 0), (0, 0)))
    xp = jnp.pad(x, ((0, 0), (0, 0), (1, 1), (1, 1))).reshape(b_pad, Cin, HWp)
    xf = jnp.pad(xp, ((0, 0), (0, 0), (0, Mimg - HWp)))              # (b_pad, Cin, Mimg)

    # conv1 im2col: 9 lane-shifted copies stacked on the channel (sublane) axis
    shifted = []
    for off in taps:
        if off >= 0:
            s = jnp.pad(xf[:, :, off:], ((0, 0), (0, 0), (0, off)))
        else:
            s = jnp.pad(xf[:, :, :off], ((0, 0), (0, 0), (-off, 0)))
        shifted.append(s)
    xcol = jnp.concatenate(shifted, axis=1)                          # (b_pad, 9*Cin, Mimg)
    # concatenate bblk images along the lane axis per grid step
    xcol = (xcol.reshape(num_steps, bblk, 9 * Cin, Mimg)
                .transpose(0, 2, 1, 3)
                .reshape(num_steps, 9 * Cin, n_out))

    # ------------- weights: flatten, fold BN scales, fuse 1x1 downsample -------------
    s1, b1 = _fold_bn(*bn1)
    s2, b2 = _fold_bn(*bn2)
    sd, bd = _fold_bn(*bnd)

    w1f = jnp.transpose(w1_oihw, (0, 2, 3, 1)).reshape(Cp, 9 * Cin).astype(jnp.float32)
    w1f = w1f * s1[:, None]
    wd2 = wd_oihw[:, :, 0, 0].astype(jnp.float32) * sd[:, None]      # (Cp, Cin)
    wdf = jnp.zeros((Cp, 9 * Cin), jnp.float32).at[:, 4 * Cin:5 * Cin].set(wd2)
    w1d = jnp.concatenate([w1f, wdf], axis=0)                        # (2*Cp, 9*Cin)
    b1d = jnp.concatenate([b1, bd]).reshape(2 * Cp, 1)

    w2f = jnp.transpose(w2_oihw, (0, 2, 3, 1)).reshape(Cp, 9 * Cp).astype(jnp.float32)
    w2f = w2f * s2[:, None]
    b2f = b2.reshape(Cp, 1)

    # interior mask of one padded frame, tiled over the bblk lane slots
    rows = jnp.arange(Hp).reshape(Hp, 1)
    cols = jnp.arange(Wp).reshape(1, Wp)
    interior = ((rows >= 1) & (rows <= H) & (cols >= 1) & (cols <= W)).astype(jnp.float32)
    slot = jnp.pad(interior.reshape(HWp), (0, Mimg - HWp))
    mask = jnp.tile(slot, bblk).reshape(1, n_out)

    kernel = functools.partial(basic_res_block_kernel, taps=taps)

    out = pl.pallas_call(
        kernel,
        out_shape=jax.ShapeDtypeStruct((num_steps, Cp, n_out), jnp.float32),
        grid_spec=pltpu.PrefetchScalarGridSpec(
            num_scalar_prefetch=0,
            grid=(num_steps,),
            in_specs=[
                pl.BlockSpec((1, 9 * Cin, n_out), lambda s: (s, 0, 0)),
                pl.BlockSpec((2 * Cp, 9 * Cin), lambda s: (0, 0)),
                pl.BlockSpec((2 * Cp, 1), lambda s: (0, 0)),
                pl.BlockSpec((Cp, 9 * Cp), lambda s: (0, 0)),
                pl.BlockSpec((Cp, 1), lambda s: (0, 0)),
                pl.BlockSpec((1, n_out), lambda s: (0, 0)),
            ],
            out_specs=pl.BlockSpec((1, Cp, n_out), lambda s: (s, 0, 0)),
            scratch_shapes=[
                pltpu.VMEM((Cp, n_out + 2 * LANE), jnp.float32),     # mid slab
                pltpu.VMEM((9 * Cp, n_out), jnp.float32),            # conv2 im2col
            ],
        ),
        compiler_params=pltpu.CompilerParams(
            dimension_semantics=("parallel",)),    # v7x: steps shared by both TensorCores
    )(xcol, w1d, b1d, w2f, b2f, mask)

    # un-blockify, drop alignment pad and the 1-pixel frame ring
    out = (out.reshape(num_steps, Cp, bblk, Mimg)
              .transpose(0, 2, 1, 3)
              .reshape(b_pad, Cp, Mimg))[:B, :, :HWp]
    return out.reshape(B, Cp, Hp, Wp)[:, :, 1:H + 1, 1:W + 1]


# ---------------- pure-JAX reference (NCHW, matches PyTorch semantics) ----------------
def ref_forward(x, w1, bn1, w2, bn2, wd, bnd):
    def conv(x, w, pad):
        return jax.lax.conv_general_dilated(
            x, w, window_strides=(1, 1), padding=[(pad, pad), (pad, pad)],
            dimension_numbers=('NCHW', 'OIHW', 'NCHW'))

    def bn(x, p):
        g, b, m, v = p
        return (g[None, :, None, None] * (x - m[None, :, None, None])
                / jnp.sqrt(v[None, :, None, None] + BN_EPS) + b[None, :, None, None])

    out = jnp.maximum(bn(conv(x, w1, 1), bn1), 0.0)
    out = bn(conv(out, w2, 1), bn2)
    ident = bn(conv(x, wd, 0), bnd)
    return jnp.maximum(out + ident, 0.0)


if __name__ == "__main__":
    B, Cin, Cp, H, W = 2, 4, 8, 16, 16  # inplanes=4, planes=8, stride=1

    key = jax.random.PRNGKey(0)
    ks = jax.random.split(key, 12)

    x = jax.random.normal(ks[0], (B, Cin, H, W), jnp.float32)

    w1 = jax.random.normal(ks[1], (Cp, Cin, 3, 3), jnp.float32) * 0.2
    w2 = jax.random.normal(ks[2], (Cp, Cp, 3, 3), jnp.float32) * 0.2
    wd = jax.random.normal(ks[3], (Cp, Cin, 1, 1), jnp.float32) * 0.2

    def make_bn(k):
        ka, kb, kc, kd = jax.random.split(k, 4)
        gamma = 1.0 + 0.1 * jax.random.normal(ka, (Cp,), jnp.float32)
        beta = 0.1 * jax.random.normal(kb, (Cp,), jnp.float32)
        mean = 0.1 * jax.random.normal(kc, (Cp,), jnp.float32)
        var = jnp.abs(jax.random.normal(kd, (Cp,), jnp.float32)) + 0.5
        return (gamma, beta, mean, var)

    bn1 = make_bn(ks[4])
    bn2 = make_bn(ks[5])
    bnd = make_bn(ks[6])

    out = basic_res_conv_block(x, w1, bn1, w2, bn2, wd, bnd)
    out = jax.block_until_ready(out)

    ref = ref_forward(x, w1, bn1, w2, bn2, wd, bnd)
    assert out.shape == (B, Cp, H, W), out.shape
    assert jnp.allclose(out, ref, atol=1e-4, rtol=1e-4), \
        f"max abs err = {jnp.max(jnp.abs(out - ref))}"

    print("KERNEL_OK")
</pallas_src>

<mosaic_0001>
module attributes {stable_mosaic.version = 11 : i64} {
  func.func @basic_res_block_kernel(%arg0: i32, %arg1: memref<1x36x384xf32, #tpu.memory_space<vmem>>, %arg2: memref<16x36xf32, #tpu.memory_space<vmem>>, %arg3: memref<16x1xf32, #tpu.memory_space<vmem>>, %arg4: memref<8x72xf32, #tpu.memory_space<vmem>>, %arg5: memref<8x1xf32, #tpu.memory_space<vmem>>, %arg6: memref<1x384xf32, #tpu.memory_space<vmem>>, %arg7: memref<1x8x384xf32, #tpu.memory_space<vmem>>, %arg8: memref<8x640xf32, #tpu.memory_space<vmem>>, %arg9: memref<72x384xf32, #tpu.memory_space<vmem>>) attributes {dimension_semantics = [#tpu.dimension_semantics<parallel>], iteration_bounds = array<i64: 2>, scalar_prefetch = 0 : i64, scratch_operands = 2 : i64, tpu.core_type = #tpu.core_type<tc>, window_params = [{transform_indices = @transform_0, window_bounds = array<i64: 1, 36, 384>}, {pipeline_mode = #tpu.pipeline_mode<synchronous>, transform_indices = @transform_1, window_bounds = array<i64: 16, 36>}, {pipeline_mode = #tpu.pipeline_mode<synchronous>, transform_indices = @transform_2, window_bounds = array<i64: 16, 1>}, {pipeline_mode = #tpu.pipeline_mode<synchronous>, transform_indices = @transform_3, window_bounds = array<i64: 8, 72>}, {pipeline_mode = #tpu.pipeline_mode<synchronous>, transform_indices = @transform_4, window_bounds = array<i64: 8, 1>}, {pipeline_mode = #tpu.pipeline_mode<synchronous>, transform_indices = @transform_5, window_bounds = array<i64: 1, 384>}, {transform_indices = @transform_6, window_bounds = array<i64: 1, 8, 384>}]} {
    %c0_i32 = arith.constant 0 : i32
    %0 = arith.cmpi eq, %arg0, %c0_i32 : i32
    %1 = arith.extui %0 : i1 to i32
    %c0_i32_0 = arith.constant 0 : i32
    %2 = arith.cmpi ne, %1, %c0_i32_0 : i32
    scf.if %2 {
      %cst_42 = arith.constant 0.000000e+00 : f32
      %52 = vector.broadcast %cst_42 : f32 to vector<8x128xf32>
      %c0_43 = arith.constant 0 : index
      %c0_44 = arith.constant 0 : index
      %53 = vector.load %arg8[%c0_43, %c0_44] : memref<8x640xf32, #tpu.memory_space<vmem>>, vector<8x128xf32>
      tpu.vector_store %arg8[%c0_43, %c0_44], %52 {strides = array<i32>} : memref<8x640xf32, #tpu.memory_space<vmem>>, vector<8x128xf32>,
      %cst_45 = arith.constant 0.000000e+00 : f32
      %54 = vector.broadcast %cst_45 : f32 to vector<8x128xf32>
      %c0_46 = arith.constant 0 : index
      %c512 = arith.constant 512 : index
      %55 = vector.load %arg8[%c0_46, %c512] : memref<8x640xf32, #tpu.memory_space<vmem>>, vector<8x128xf32>
      tpu.vector_store %arg8[%c0_46, %c512], %54 {strides = array<i32>} : memref<8x640xf32, #tpu.memory_space<vmem>>, vector<8x128xf32>,
    } else {
    }
    %c0 = arith.constant 0 : index
    %c0_1 = arith.constant 0 : index
    %3 = vector.load %arg2[%c0, %c0_1] : memref<16x36xf32, #tpu.memory_space<vmem>>, vector<16x36xf32>
    %c0_2 = arith.constant 0 : index
    %c0_3 = arith.constant 0 : index
    %c0_4 = arith.constant 0 : index
    %4 = vector.load %arg1[%c0_2, %c0_3, %c0_4] : memref<1x36x384xf32, #tpu.memory_space<vmem>>, vector<1x36x384xf32>
    %5 = vector.shape_cast %4 : vector<1x36x384xf32> to vector<36x384xf32>
    %cst = arith.constant dense<0.000000e+00> : vector<16x384xf32>
    %6 = tpu.matmul %3, %5, %cst {dimension_numbers = #tpu.dot_dimension_numbers<[1], [0], [0], [1], [0, 0, 1, 1], [], []>} : vector<16x36xf32>, vector<36x384xf32>, vector<16x384xf32> -> vector<16x384xf32>
    %c0_5 = arith.constant 0 : index
    %c0_6 = arith.constant 0 : index
    %7 = vector.load %arg3[%c0_5, %c0_6] : memref<16x1xf32, #tpu.memory_space<vmem>>, vector<16x1xf32>
    %8 = vector.extract_strided_slice %6 {offsets = [0, 0], sizes = [8, 384], strides = [1, 1]} : vector<16x384xf32> to vector<8x384xf32>
    %9 = vector.extract_strided_slice %7 {offsets = [0, 0], sizes = [8, 1], strides = [1, 1]} : vector<16x1xf32> to vector<8x1xf32>
    %10 = vector.broadcast %9 : vector<8x1xf32> to vector<8x384xf32>
    %11 = arith.addf %8, %10 : vector<8x384xf32>
    %cst_7 = arith.constant 0.000000e+00 : f32
    %12 = vector.broadcast %cst_7 : f32 to vector<8x384xf32>
    %13 = arith.maximumf %11, %12 : vector<8x384xf32>
    %c0_8 = arith.constant 0 : index
    %c0_9 = arith.constant 0 : index
    %14 = vector.load %arg6[%c0_8, %c0_9] : memref<1x384xf32, #tpu.memory_space<vmem>>, vector<1x384xf32>
    %15 = vector.broadcast %14 : vector<1x384xf32> to vector<8x384xf32>
    %16 = arith.mulf %13, %15 : vector<8x384xf32>
    %17 = vector.extract_strided_slice %6 {offsets = [8, 0], sizes = [8, 384], strides = [1, 1]} : vector<16x384xf32> to vector<8x384xf32>
    %18 = vector.extract_strided_slice %7 {offsets = [8, 0], sizes = [8, 1], strides = [1, 1]} : vector<16x1xf32> to vector<8x1xf32>
    %19 = vector.broadcast %18 : vector<8x1xf32> to vector<8x384xf32>
    %20 = arith.addf %17, %19 : vector<8x384xf32>
    %c0_10 = arith.constant 0 : index
    %c128 = arith.constant 128 : index
    %21 = vector.load %arg8[%c0_10, %c128] : memref<8x640xf32, #tpu.memory_space<vmem>>, vector<8x384xf32>
    tpu.vector_store %arg8[%c0_10, %c128], %16 {strides = array<i32>} : memref<8x640xf32, #tpu.memory_space<vmem>>, vector<8x384xf32>,
    %c0_11 = arith.constant 0 : index
    %c109 = arith.constant 109 : index
    %22 = vector.load %arg8[%c0_11, %c109] : memref<8x640xf32, #tpu.memory_space<vmem>>, vector<8x384xf32>
    %c0_12 = arith.constant 0 : index
    %c0_13 = arith.constant 0 : index
    %23 = vector.load %arg9[%c0_12, %c0_13] : memref<72x384xf32, #tpu.memory_space<vmem>>, vector<8x384xf32>
    tpu.vector_store %arg9[%c0_12, %c0_13], %22 {strides = array<i32>} : memref<72x384xf32, #tpu.memory_space<vmem>>, vector<8x384xf32>,
    %c0_14 = arith.constant 0 : index
    %c110 = arith.constant 110 : index
    %24 = vector.load %arg8[%c0_14, %c110] : memref<8x640xf32, #tpu.memory_space<vmem>>, vector<8x384xf32>
    %c8 = arith.constant 8 : index
    %c0_15 = arith.constant 0 : index
    %25 = vector.load %arg9[%c8, %c0_15] : memref<72x384xf32, #tpu.memory_space<vmem>>, vector<8x384xf32>
    tpu.vector_store %arg9[%c8, %c0_15], %24 {strides = array<i32>} : memref<72x384xf32, #tpu.memory_space<vmem>>, vector<8x384xf32>,
    %c0_16 = arith.constant 0 : index
    %c111 = arith.constant 111 : index
    %26 = vector.load %arg8[%c0_16, %c111] : memref<8x640xf32, #tpu.memory_space<vmem>>, vector<8x384xf32>
    %c16 = arith.constant 16 : index
    %c0_17 = arith.constant 0 : index
    %27 = vector.load %arg9[%c16, %c0_17] : memref<72x384xf32, #tpu.memory_space<vmem>>, vector<8x384xf32>
    tpu.vector_store %arg9[%c16, %c0_17], %26 {strides = array<i32>} : memref<72x384xf32, #tpu.memory_space<vmem>>, vector<8x384xf32>,
    %c0_18 = arith.constant 0 : index
    %c127 = arith.constant 127 : index
    %28 = vector.load %arg8[%c0_18, %c127] : memref<8x640xf32, #tpu.memory_space<vmem>>, vector<8x384xf32>
    %c24 = arith.constant 24 : index
    %c0_19 = arith.constant 0 : index
    %29 = vector.load %arg9[%c24, %c0_19] : memref<72x384xf32, #tpu.memory_space<vmem>>, vector<8x384xf32>
    tpu.vector_store %arg9[%c24, %c0_19], %28 {strides = array<i32>} : memref<72x384xf32, #tpu.memory_space<vmem>>, vector<8x384xf32>,
    %c0_20 = arith.constant 0 : index
    %c128_21 = arith.constant 128 : index
    %30 = vector.load %arg8[%c0_20, %c128_21] : memref<8x640xf32, #tpu.memory_space<vmem>>, vector<8x384xf32>
    %c32 = arith.constant 32 : index
    %c0_22 = arith.constant 0 : index
    %31 = vector.load %arg9[%c32, %c0_22] : memref<72x384xf32, #tpu.memory_space<vmem>>, vector<8x384xf32>
    tpu.vector_store %arg9[%c32, %c0_22], %30 {strides = array<i32>} : memref<72x384xf32, #tpu.memory_space<vmem>>, vector<8x384xf32>,
    %c0_23 = arith.constant 0 : index
    %c129 = arith.constant 129 : index
    %32 = vector.load %arg8[%c0_23, %c129] : memref<8x640xf32, #tpu.memory_space<vmem>>, vector<8x384xf32>
    %c40 = arith.constant 40 : index
    %c0_24 = arith.constant 0 : index
    %33 = vector.load %arg9[%c40, %c0_24] : memref<72x384xf32, #tpu.memory_space<vmem>>, vector<8x384xf32>
    tpu.vector_store %arg9[%c40, %c0_24], %32 {strides = array<i32>} : memref<72x384xf32, #tpu.memory_space<vmem>>, vector<8x384xf32>,
    %c0_25 = arith.constant 0 : index
    %c145 = arith.constant 145 : index
    %34 = vector.load %arg8[%c0_25, %c145] : memref<8x640xf32, #tpu.memory_space<vmem>>, vector<8x384xf32>
    %c48 = arith.constant 48 : index
    %c0_26 = arith.constant 0 : index
    %35 = vector.load %arg9[%c48, %c0_26] : memref<72x384xf32, #tpu.memory_space<vmem>>, vector<8x384xf32>
    tpu.vector_store %arg9[%c48, %c0_26], %34 {strides = array<i32>} : memref<72x384xf32, #tpu.memory_space<vmem>>, vector<8x384xf32>,
    %c0_27 = arith.constant 0 : index
    %c146 = arith.constant 146 : index
    %36 = vector.load %arg8[%c0_27, %c146] : memref<8x640xf32, #tpu.memory_space<vmem>>, vector<8x384xf32>
    %c56 = arith.constant 56 : index
    %c0_28 = arith.constant 0 : index
    %37 = vector.load %arg9[%c56, %c0_28] : memref<72x384xf32, #tpu.memory_space<vmem>>, vector<8x384xf32>
    tpu.vector_store %arg9[%c56, %c0_28], %36 {strides = array<i32>} : memref<72x384xf32, #tpu.memory_space<vmem>>, vector<8x384xf32>,
    %c0_29 = arith.constant 0 : index
    %c147 = arith.constant 147 : index
    %38 = vector.load %arg8[%c0_29, %c147] : memref<8x640xf32, #tpu.memory_space<vmem>>, vector<8x384xf32>
    %c64 = arith.constant 64 : index
    %c0_30 = arith.constant 0 : index
    %39 = vector.load %arg9[%c64, %c0_30] : memref<72x384xf32, #tpu.memory_space<vmem>>, vector<8x384xf32>
    tpu.vector_store %arg9[%c64, %c0_30], %38 {strides = array<i32>} : memref<72x384xf32, #tpu.memory_space<vmem>>, vector<8x384xf32>,
    %c0_31 = arith.constant 0 : index
    %c0_32 = arith.constant 0 : index
    %40 = vector.load %arg4[%c0_31, %c0_32] : memref<8x72xf32, #tpu.memory_space<vmem>>, vector<8x72xf32>
    %c0_33 = arith.constant 0 : index
    %c0_34 = arith.constant 0 : index
    %41 = vector.load %arg9[%c0_33, %c0_34] : memref<72x384xf32, #tpu.memory_space<vmem>>, vector<72x384xf32>
    %cst_35 = arith.constant dense<0.000000e+00> : vector<8x384xf32>
    %42 = tpu.matmul %40, %41, %cst_35 {dimension_numbers = #tpu.dot_dimension_numbers<[1], [0], [0], [1], [0, 0, 1, 1], [], []>} : vector<8x72xf32>, vector<72x384xf32>, vector<8x384xf32> -> vector<8x384xf32>
    %c0_36 = arith.constant 0 : index
    %c0_37 = arith.constant 0 : index
    %43 = vector.load %arg5[%c0_36, %c0_37] : memref<8x1xf32, #tpu.memory_space<vmem>>, vector<8x1xf32>
    %44 = vector.broadcast %43 : vector<8x1xf32> to vector<8x384xf32>
    %45 = arith.addf %42, %44 : vector<8x384xf32>
    %46 = arith.addf %45, %20 : vector<8x384xf32>
    %cst_38 = arith.constant 0.000000e+00 : f32
    %47 = vector.broadcast %cst_38 : f32 to vector<8x384xf32>
    %48 = arith.maximumf %46, %47 : vector<8x384xf32>
    %c0_39 = arith.constant 0 : index
    %c0_40 = arith.constant 0 : index
    %c0_41 = arith.constant 0 : index
    %49 = vector.load %arg7[%c0_39, %c0_40, %c0_41] : memref<1x8x384xf32, #tpu.memory_space<vmem>>, vector<1x8x384xf32>
    %50 = vector.shape_cast %49 : vector<1x8x384xf32> to vector<8x384xf32>
    %51 = vector.shape_cast %48 : vector<8x384xf32> to vector<1x8x384xf32>
    tpu.vector_store %arg7[%c0_39, %c0_40, %c0_41], %51 {strides = array<i32>} : memref<1x8x384xf32, #tpu.memory_space<vmem>>, vector<1x8x384xf32>,
    return
  }
  func.func @transform_0(%arg0: i32) -> (i32, i32, i32) {
    %c0_i32 = arith.constant 0 : i32
    %c0_i32_0 = arith.constant 0 : i32
    %c0_i32_1 = arith.constant 0 : i32
    return %arg0, %c0_i32, %c0_i32_0 : i32, i32, i32
  }
  func.func @transform_1(%arg0: i32) -> (i32, i32) {
    %c0_i32 = arith.constant 0 : i32
    %c0_i32_0 = arith.constant 0 : i32
    %c0_i32_1 = arith.constant 0 : i32
    return %c0_i32, %c0_i32_0 : i32, i32
  }
  func.func @transform_2(%arg0: i32) -> (i32, i32) {
    %c0_i32 = arith.constant 0 : i32
    %c0_i32_0 = arith.constant 0 : i32
    %c0_i32_1 = arith.constant 0 : i32
    return %c0_i32, %c0_i32_0 : i32, i32
  }
  func.func @transform_3(%arg0: i32) -> (i32, i32) {
    %c0_i32 = arith.constant 0 : i32
    %c0_i32_0 = arith.constant 0 : i32
    %c0_i32_1 = arith.constant 0 : i32
    return %c0_i32, %c0_i32_0 : i32, i32
  }
  func.func @transform_4(%arg0: i32) -> (i32, i32) {
    %c0_i32 = arith.constant 0 : i32
    %c0_i32_0 = arith.constant 0 : i32
    %c0_i32_1 = arith.constant 0 : i32
    return %c0_i32, %c0_i32_0 : i32, i32
  }
  func.func @transform_5(%arg0: i32) -> (i32, i32) {
    %c0_i32 = arith.constant 0 : i32
    %c0_i32_0 = arith.constant 0 : i32
    %c0_i32_1 = arith.constant 0 : i32
    return %c0_i32, %c0_i32_0 : i32, i32
  }
  func.func @transform_6(%arg0: i32) -> (i32, i32, i32) {
    %c0_i32 = arith.constant 0 : i32
    %c0_i32_0 = arith.constant 0 : i32
    %c0_i32_1 = arith.constant 0 : i32
    return %arg0, %c0_i32, %c0_i32_0 : i32, i32, i32
  }
}

</mosaic_0001>

<bundles_post_ra>
// kernel: tpu_custom_call.1
= control target key start
LH: loop header
LB: loop body
LE: loop exit
PB: predicated region body
PF: predicated region fallthrough
CT: control target
= control target key end

     0   :  { %11 = vsyncpa [#allocation5], 0  ;;  %s1519_s0 = inlined_call_operand.vmem [shape: f32[2,36,384], index: 0, kind: input, shape index: {}]   ;;  %s1520_s1 = inlined_call_operand.vmem [shape: f32[16,36], index: 1, kind: input, shape index: {}]   ;;  %s1521_s2 = inlined_call_operand.vmem [shape: f32[16,1], index: 2, kind: input, shape index: {}]   ;;  %s1522_s3 = inlined_call_operand.vmem [shape: f32[8,72], index: 3, kind: input, shape index: {}]   ;;  %s1523_s4 = inlined_call_operand.vmem [shape: f32[8,1], index: 4, kind: input, shape index: {}]   ;;  %s1524_s5 = inlined_call_operand.vmem [shape: f32[1,384], index: 5, kind: input, shape index: {}]   ;;  %s1525_s6 = inlined_call_operand.hbm [shape: f32[2,8,384], index: 6, kind: output, shape index: {}]  }
   0x1   :  { %13 = vsyncpa [#allocation5 + $0x1], 0  ;;  %s1321_s21 = smov 0   ;;  %s1323_s22 = smov 0  }
   0x2   :  { %s1325_s23 = smov 0   ;;  %s1327_s24 = smov 0  }
   0x3 LB: > { %s1342_s25 = sadd.s32 4294967295, %s1270_s24   ;;  %s962_s26 = sadd.s32 4294967294, %s1270_s24   ;;  %s1270_s24 = sphi %s1327_s24, %s1531_s24   ;;  %s1266_s23 = sphi %s1325_s23, %s1530_s23   ;;  %s1262_s22 = sphi %s1323_s22, %s1529_s22   ;;  %s1258_s21 = sphi %s1321_s21, %s1528_s21  }
   0x4   : > { %s1346_s27 = sadd.s32 1, %s1270_s24   ;;  %s157_s28 = sadd.s32 1, %s1266_s23 }
   0x5   : > { %s154_s29 = ssub.s32 %s1270_s24, %s1346_s27  ;;  %p167_p0 = scmp.ne.s32.totalorder %s1266_s23, %s1262_s22 }
   0x6   : > { %p155_p1 = scmp.eq.s32.totalorder %s154_s29, 0  ;;  %p168_p2 = scmp.eq.s32.totalorder %s1342_s25, 1 }
   0x7   : > { %p173_p3 = scmp.ne.s32.totalorder %s1262_s22, %s1258_s21  ;;  %p174_p4 = scmp.eq.s32.totalorder %s962_s26, 1 }
   0x8   : > { %s1357_s30 = scalar_select %p155_p1, %s1266_s23, %s157_s28  }
   0x9   : > { %p1359_p5 = por %p168_p2, %p167_p0  ;;  %p1363_p6 = por %p174_p4, %p173_p3 }
   0xa   : > { %p965_p7 = scmp.ge.s32.totalorder %s1270_s24, 1  ;;  %p215_p8 = scmp.lt.s32.totalorder %s1270_s24, 3 }
   0xc   : > { %p216_p9 = pnand %p965_p7, %p215_p8 }
   0xd   : > { %s242_s9 = sand.u32 (!%p216_p9), 1, %s1262_s22   ;;  %p245_p10 = scmp.lt.s32.totalorder (!%p216_p9), %s1342_s25, 1 }
   0xe   : > { %219 = sbr.rel (%p216_p9) target bundleno = 645 (0x285), region = 44  ;;  %p967_p11 = scmp.ne.s32.totalorder (!%p216_p9), %s1342_s25, 0 }
   0xf   : > { %s1081_s10 = smul.u32 (!%p216_p9), 24, %s242_s9 }
  0x11   : > { %s1379_s16 = scalar_lea.vmem (!%p216_p9), [#allocation4], %s1081_s10 }
  0x15   : > { %s246_s11 = scalar_select %p245_p10, %s1342_s25, 1 }
  0x16   : > { %253 = sbr.rel (%p967_p11) target bundleno = 29 (0x1d), region = 48  ;;  %v1272_v0 = vmov (!%p967_p11), 0.0  }
  0x17   : > { %s1082_s12 = smul.u32 120, %s246_s11  ;;  %254 = vst [vmem:[#allocation2] sm:$0xff] (!%p967_p11), %v1272_v0  ;;  %255 = vst [vmem:[#allocation2 + $0x20] sm:$0xff] (!%p967_p11), %v1272_v0 }
  0x19   : > { %s1377_s15 = scalar_lea.vmem %s1519_s0, %s1082_s12 }
  0x1d PF: > { %v259_v1 = vld [vmem:[%s1377_s15 + $0x8] sm:$0xff]  ;;  %v262_v2 = vld [vmem:[%s1377_s15 + $0x20] sm:$0xff]  ;;  %v260_v3 = vld [vmem:[%s1377_s15 + $0x10] sm:$0xff]  ;;  %v1273_v8 = vmov 0.0   ;;  %v1274_v14 = vmov 0   ;;  %vm273_vm0 = vcmask 293888   ;;  %v457_v27 = vlaneseq }
  0x1e   : > { %v1031_v4 = vpack.c.bf16 %v262_v2, %v259_v1  ;;  %v263_v5 = vld [vmem:[%s1377_s15 + $0x28] sm:$0xff]  ;;  %v258_v6 = vld [vmem:[%s1377_s15] sm:$0xff]  ;;  %v261_v7 = vld [vmem:[%s1377_s15 + $0x18] sm:$0xff]  ;;  %354 = vmatprep.mubr.f32.mxu0 %v1273_v8  ;;  %1136 = vset.pattern.permute.xlu0 %v1274_v14  ;;  %vm280_vm1 = vcmask 1043456   ;;  %s1275_s11 = smov 127   ;;  %v1276_v54 = vmov 0.0|0.0  }
  0x1f   : > { %v1039_v9 = vpack.c.bf16 %v263_v5, %v260_v3  ;;  %v1033_v10 = vpack.c.bf16 %v261_v7, %v258_v6  ;;  %v265_v11 = vld [vmem:[%s1377_s15 + $0x38] sm:$0xff]  ;;  %v268_v12 = vld [vmem:[%s1377_s15 + $0x50] sm:$0xff]  ;;  %v266_v13 = vld [vmem:[%s1377_s15 + $0x40] sm:$0xff]  ;;  %1207 = vset.pattern.permute.xlu1 %v1274_v14  ;;  %v458_v28 = vshrl.u32 %v457_v27, 7  ;;  %s1277_s12 = smov 19   ;;  %s1278_s13 = smov 18  }
  0x20   : > { %1032 = vmatprep.subr.bf16.mxu0 %v1031_v4  ;;  %v1035_v15 = vpack.c.bf16 %v268_v12, %v265_v11  ;;  %v269_v16 = vld [vmem:[%s1377_s15 + $0x58] sm:$0xff]  ;;  %v264_v17 = vld [vmem:[%s1377_s15 + $0x30] sm:$0xff]  ;;  %v267_v18 = vld [vmem:[%s1377_s15 + $0x48] sm:$0xff]  ;;  %s1279_s14 = smov 17   ;;  %s1281_s17 = smov 111   ;;  %vm1282_vm2 = vmmov 0  }
  0x21   : > { %1040 = vmatprep.subr.bf16.mxu1 %v1039_v9  ;;  %1034 = vmatpush1.bf16.msra.mxu0 %v1033_v10  ;;  %v1043_v19 = vpack.c.bf16 %v269_v16, %v266_v13  ;;  %v1037_v20 = vpack.c.bf16 %v267_v18, %v264_v17  ;;  %v256_v21 = vld [vmem:[%s1520_s1] sm:$0xff]  ;;  %v271_v23 = vld [vmem:[%s1377_s15 + $0x68] sm:$0xf]  ;;  %v272_v24 = vld [vmem:[%s1377_s15 + $0x70] sm:$0xf]  ;;  %v459_v29 = vsub.s32 0, %v458_v28 }
  0x22   : > { %1042 = vmatpush3.bf16.msra.mxu1 %v1039_v9  ;;  %1036 = vmatprep.subr.bf16.mxu0 %v1035_v15  ;;  %v442_v22 = vld [vmem:[%s1521_s2] sm:$0xff]  ;;  %v257_v26 = vld [vmem:[%s1520_s1 + $0x8] sm:$0xff]  ;;  %v463_v32 = vsub.s32 1, %v458_v28  ;;  %v467_v33 = vsub.s32 2, %v458_v28  ;;  %s1283_s18 = smov 110   ;;  %s1284_s19 = smov 109  }
  0x23   : > { %1044 = vmatprep.subr.bf16.mxu1 %v1043_v19  ;;  %1007 = vmatprep.mubr.msk.f32.mxu1 %vm273_vm0, %v256_v21  ;;  %v270_v25 = vld [vmem:[%s1377_s15 + $0x60] sm:$0xf]  ;;  %s1280_s15 = smov 1   ;;  %v443_v58 = vld [vmem:[%s1521_s2 + $0x8] sm:$0xff]  ;;  %vm502_vm3 = vcmask 154624   ;;  %vm528_vm4 = vcmask 146432  }
  0x24   : > { %446 = vperm.xlu0 %1136, %v442_v22   ;;  %v455_v31 = vld [vmem:[%s1524_s5] sm:$0x7]  ;;  %vm554_vm5 = vcmask 138240   ;;  %vm580_vm6 = vcmask 7168   ;;  %vm612_vm7 = vcmask 1039360   ;;  %vm638_vm8 = vcmask 908288  }
  0x25   : > { %1038 = vmatpush1.bf16.msra.mxu0 %v1037_v20  ;;  %v460_v36 = vrot.slane %v455_v31, %v459_v29  ;;  %v464_v40 = vrot.slane %v455_v31, %v463_v32  ;;  %v468_v44 = vrot.slane %v455_v31, %v467_v33  ;;  %v599_v46 = vld [vmem:[#allocation2 + $0x20] sm:$0xff]  ;;  %vm664_vm9 = vcmask 900096  }
  0x26   : > { %1046 = vmatpush3.bf16.msra.mxu1 %v1043_v19  ;;  %968 = vmatprep.subr.msk.mxu0 %vm280_vm1, %v271_v23  ;;  %v486_v50 = vld [vmem:[#allocation2] sm:$0xff]  ;;  %vm690_vm10 = vcmask 891904   ;;  %vm734_vm11 = vcmask 588800  }
  0x27   : > { %1005 = vmatprep.subr.msk.mxu1 %vm280_vm1, %v272_v24  ;;  %v728_v57 = vld [vmem:[%s1523_s4] sm:$0xff] }
  0x29   : > { %969 = vmatpush1.msk.msra.mxu0 %vm280_vm1, %v270_v25 }
  0x2a   : > { %1006 = vmatpush3.msk.msra.mxu1 %vm280_vm1, %v272_v24  ;;  %970 = vmatmul.mubr.msk.f32.vlgmr.msra.gmra.mrb[0].mxu0 %vm273_vm0, %v256_v21 }
  0x2b   : > { %1008 = vmatmul.mubr.msk.f32.vlgmr.msra.gmra.mrb[0].mxu1 %vm273_vm0, %v257_v26  ;;  %360 = vmatprep.mubr.f32.mxu0 %v1273_v8 }
  0x2c   : > { %1063 = vmatprep.subr.bf16.mxu1 %v1276_v54  ;;  %1028 = vmatprep.mubr.msk.f32.mxu1 %vm1282_vm2, %v1273_v8 }
  0x2e   : > { %971 = vmatmul.mubr.msk.f32.gmra.mrb[2].mxu0 %vm273_vm0, %v257_v26 }
  0x2f   : > { %802 = vmatprep.mubr.f32.mxu0 %v1273_v8 }
  0xa3   : > { %v447_v30 = vpop.permute.xlu0 %446 }
  0xfd   : > { %v356_v34 = vpop.f32.mrb[0].mxu0 }
  0xfe   : > { %v449_v35 = vadd.f32 %v447_v30, %v356_v34  ;;  %v1416_v37 = vpop.f32.mrb[0].mxu1  ;;  %v358_v38 = vpop.f32.mrb[1].mxu0 }
  0xff   : > { %v450_v39 = vadd.f32 %v447_v30, %v358_v38  ;;  %v433_v41 = vpop.f32.mrb[1].mxu1 }
 0x100   : > { %v452_v42 = vmax.f32 %v449_v35, 0.0  ;;  %v451_v43 = vadd.f32 %v447_v30, %v433_v41 }
 0x101   : > { %v453_v45 = vmax.f32 %v450_v39, 0.0 }
 0x102   : > { %v1418_v47 = vmul.f32 %v460_v36, %v452_v42  ;;  %v454_v48 = vmax.f32 %v451_v43, 0.0 }
 0x103   : > { %v1420_v49 = vmul.f32 %v464_v40, %v453_v45 }
 0x104   : > { %v1422_v51 = vmul.f32 %v468_v44, %v454_v48  ;;  %v1137_v52 = vpack.i.bf16 %v1418_v47, %v599_v46 }
 0x105   : > { %v1142_v55 = vpack.i.bf16 %v1420_v49, %v1418_v47 }
 0x106   : > { %1138 = vrot.lane.b32.xlu0 %v1137_v52, %s1275_s11  ;;  %v1147_v53 = vpack.i.bf16 %v486_v50, %v1422_v51  ;;  %v1192_v56 = vpack.i.bf16 %v1422_v51, %v1420_v49 }
 0x108   : > { %1148 = vrot.lane.b32.xlu1 %v1147_v53, %s1277_s12 }
 0x10a   : > { %1143 = vrot.lane.b32.xlu0 %v1142_v55, %s1277_s12  ;;  %s1083_s12 = smul.u32 384, %s1342_s25  ;;  %s889_s25 = scalar_lea.sflag [#allocation5], %s242_s9 }
 0x10c   : > { %1153 = vrot.lane.b32.xlu1 %v1142_v55, %s1278_s13 }
 0x10e   : > { %1158 = vrot.lane.b32.xlu0 %v1147_v53, %s1278_s13  ;;  %s903_s13 = sshll.u32 %s1379_s16, 4  ;;  %s1474_s13 = int_to_ptr.vmem [resolvable:$true] %s903_s13 }
 0x110   : > { %1163 = vrot.lane.b32.xlu1 %v1142_v55, %s1279_s14 }
 0x112   : > { %1168 = vrot.lane.b32.xlu0 %v1147_v53, %s1279_s14 }
 0x114   : > { %1173 = vrot.lane.b32.xlu1 %v1142_v55, %s1280_s15 }
 0x116   : > { %1178 = vrot.lane.b32.xlu0 %v1147_v53, %s1280_s15 }
 0x118   : > { %1193 = vrot.lane.b32.xlu1 %v1192_v56, %s1275_s11 }
 0x11a   : > { %1183 = vrot.lane.b32.xlu0 %v1137_v52, %s1281_s17 }
 0x11c   : > { %1198 = vrot.lane.b32.xlu1 %v1192_v56, %s1281_s17  ;;  %s1472_s17 = scalar_lea.hbm %s1525_s6, %s1083_s12 }
 0x11e   : > { %1188 = vrot.lane.b32.xlu0 %v1137_v52, %s1283_s18 }
 0x120   : > { %1203 = vrot.lane.b32.xlu1 %v1192_v56, %s1283_s18  ;;  %s1208_s18 = scalar_lea.vmem %s1474_s13, 384 }
 0x121   : > { %p1209_p12 = scmp.ne.s32.totalorder %s1474_s13, %s1208_s18 }
 0x122   : > { %686 = vrot.lane.b32.xlu0 %v1422_v51, %s1284_s19 }
 0x123   : > { %p1210_p13 = pnand %p1209_p12, %p1359_p5 }
 0x124   : > { %684 = vrot.lane.b32.xlu1 %v1420_v49, %s1284_s19 }
 0x125   : > { %p1211_p0 = pneg %p1210_p13 }
 0x126   : > { %682 = vrot.lane.b32.xlu0 %v1418_v47, %s1284_s19 }
 0x128   : > { %688 = vrot.lane.b32.xlu1 %v599_v46, %s1284_s19  ;;  %s1285_s19 = smov [#allocation4]  }
 0x129   : > { %s1212_s20 = sshll.u32 %s1285_s19, 4  ;;  %s1213_s20 = int_to_ptr.vmem [resolvable:$false] %s1212_s20 }
 0x12a   : > { %731 = vperm.xlu0 %1136, %v728_v57   ;;  %s1214_s26 = scalar_lea.vmem %s1213_s20, 768  ;;  %p1215_p1 = scmp.lt.s32.totalorder %s1474_s13, %s1213_s20 }
 0x12b   : > { %p1216_p2 = scmp.lt.s32.totalorder %s1214_s26, %s1208_s18 }
 0x12c   : > { %477 = vperm.xlu1 %1207, %v443_v58  }
 0x12d   : > { %p1217_p3 = por %p1216_p2, %p1215_p1 }
 0x12f   : > { %p1218_p4 = pnand %p1217_p3, %p1211_p0 }
 0x178   : > { %v1139_v59 = vpop.permute.xlu0 %1138 }
 0x179   : > { %v1141_v27 = vunpack.i.h.bf16 %v1139_v59  ;;  %v1140_v33 = vunpack.i.l.bf16 %v1139_v59 }
 0x17a   : > { %v1149_v60 = vpop.permute.xlu1 %1148 }
 0x17b   : > { %v1151_v3 = vunpack.i.h.bf16 %v1149_v60  ;;  %v1150_v6 = vunpack.i.l.bf16 %v1149_v60 }
 0x17c   : > { %v1144_v61 = vpop.permute.xlu0 %1143 }
 0x17d   : > { %v1146_v62 = vunpack.i.h.bf16 %v1144_v61  ;;  %v1145_v63 = vunpack.i.l.bf16 %v1144_v61 }
 0x17e   : > { %v1154_v0 = vpop.permute.xlu1 %1153 }
 0x17f   : > { %v1156_v1 = vunpack.i.h.bf16 %v1154_v0  ;;  %v1155_v2 = vunpack.i.l.bf16 %v1154_v0  ;;  %v504_v5 = vsel %vm502_vm3, %v1145_v63, %v1146_v62  ;;  %v505_v13 = vsel %vm502_vm3, %v1146_v62, %v1150_v6 }
 0x180   : > { %v1159_v4 = vpop.permute.xlu0 %1158  ;;  %v503_v14 = vsel %vm502_vm3, %v1151_v3, %v1145_v63 }
 0x181   : > { %v1161_v7 = vunpack.i.h.bf16 %v1159_v4  ;;  %v1160_v9 = vunpack.i.l.bf16 %v1159_v4  ;;  %v530_v10 = vsel %vm528_vm4, %v1155_v2, %v1156_v1 }
 0x182   : > { %v1164_v11 = vpop.permute.xlu1 %1163  ;;  %v1047_v12 = vpack.c.bf16 %v530_v10, %v504_v5 }
 0x183   : > { %v529_v15 = vsel %vm528_vm4, %v1161_v7, %v1155_v2  ;;  %v531_v16 = vsel %vm528_vm4, %v1156_v1, %v1160_v9  ;;  %v1166_v20 = vunpack.i.h.bf16 %v1164_v11  ;;  %v1165_v21 = vunpack.i.l.bf16 %v1164_v11 }
 0x184   : > { %v1049_v17 = vpack.c.bf16 %v529_v15, %v503_v14  ;;  %v1064_v18 = vpack.c.bf16 %v531_v16, %v505_v13  ;;  %1048 = vmatprep.subr.bf16.mxu0 %v1047_v12  ;;  %v1169_v19 = vpop.permute.xlu0 %1168  ;;  %v700_v14 = vld [vmem:[%s1522_s3] sm:$0xff] }
 0x185   : > { %v1171_v22 = vunpack.i.h.bf16 %v1169_v19  ;;  %v1170_v23 = vunpack.i.l.bf16 %v1169_v19  ;;  %v556_v31 = vsel %vm554_vm5, %v1165_v21, %v1166_v20 }
 0x186   : > { %v1174_v24 = vpop.permute.xlu1 %1173  ;;  %1050 = vmatpush1.bf16.msra.mxu0 %v1049_v17  ;;  %1065 = vmatpush3.bf16.msra.mxu1 %v1064_v18 }
 0x187   : > { %v1176_v25 = vunpack.i.h.bf16 %v1174_v24  ;;  %v1175_v26 = vunpack.i.l.bf16 %v1174_v24  ;;  %1066 = vmatprep.subr.bf16.mxu1 %v1276_v54  ;;  %v555_v34 = vsel %vm554_vm5, %v1171_v22, %v1165_v21  ;;  %v557_v35 = vsel %vm554_vm5, %v1166_v20, %v1170_v23 }
 0x188   : > { %v1179_v28 = vpop.permute.xlu0 %1178 }
 0x189   : > { %v1181_v29 = vunpack.i.h.bf16 %v1179_v28  ;;  %v1180_v30 = vunpack.i.l.bf16 %v1179_v28  ;;  %v582_v32 = vsel %vm580_vm6, %v1175_v26, %v1176_v25 }
 0x18a   : > { %v1194_v36 = vpop.permute.xlu1 %1193  ;;  %v1051_v38 = vpack.c.bf16 %v582_v32, %v556_v31 }
 0x18b   : > { %v581_v39 = vsel %vm580_vm6, %v1181_v29, %v1175_v26  ;;  %v583_v40 = vsel %vm580_vm6, %v1176_v25, %v1180_v30  ;;  %v1196_v41 = vunpack.i.h.bf16 %v1194_v36  ;;  %v1195_v42 = vunpack.i.l.bf16 %v1194_v36 }
 0x18c   : > { %v1053_v43 = vpack.c.bf16 %v581_v39, %v555_v34  ;;  %v1067_v44 = vpack.c.bf16 %v583_v40, %v557_v35  ;;  %1052 = vmatprep.subr.bf16.mxu0 %v1051_v38  ;;  %v1184_v45 = vpop.permute.xlu0 %1183 }
 0x18d   : > { %v615_v46 = vsel %vm612_vm7, %v1196_v41, %v1140_v33  ;;  %v613_v48 = vsel %vm612_vm7, %v1141_v27, %v1195_v42  ;;  %v614_v52 = vsel %vm612_vm7, %v1195_v42, %v1196_v41  ;;  %v1186_v53 = vunpack.i.h.bf16 %v1184_v45 }
 0x18e   : > { %v1199_v50 = vpop.permute.xlu1 %1198  ;;  %1054 = vmatpush1.bf16.msra.mxu0 %v1053_v43  ;;  %1068 = vmatpush3.bf16.msra.mxu1 %v1067_v44  ;;  %v1185_v55 = vunpack.i.l.bf16 %v1184_v45  ;;  %v1055_v56 = vpack.c.bf16 %v614_v52, %v1420_v49  ;;  %v1070_v57 = vpack.c.bf16 %v615_v46, %v1422_v51  ;;  %v1057_v58 = vpack.c.bf16 %v613_v48, %v1418_v47 }
 0x18f   : > { %1069 = vmatprep.subr.bf16.mxu1 %v1276_v54  ;;  %v1201_v59 = vunpack.i.h.bf16 %v1199_v50  ;;  %v1200_v60 = vunpack.i.l.bf16 %v1199_v50 }
 0x190   : > { %v1189_v61 = vpop.permute.xlu0 %1188  ;;  %1056 = vmatprep.subr.bf16.mxu0 %v1055_v56 }
 0x191   : > { %v1191_v62 = vunpack.i.h.bf16 %v1189_v61  ;;  %v1190_v63 = vunpack.i.l.bf16 %v1189_v61  ;;  %v639_v49 = vsel %vm638_vm8, %v1186_v53, %v1200_v60  ;;  %v641_v51 = vsel %vm638_vm8, %v1201_v59, %v1185_v55 }
 0x192   : > { %v1204_v0 = vpop.permute.xlu1 %1203  ;;  %1058 = vmatpush1.bf16.msra.mxu0 %v1057_v58  ;;  %1071 = vmatpush3.bf16.msra.mxu1 %v1070_v57  ;;  %v640_v5 = vsel %vm638_vm8, %v1200_v60, %v1201_v59 }
 0x193   : > { %v1206_v1 = vunpack.i.h.bf16 %v1204_v0  ;;  %v1205_v2 = vunpack.i.l.bf16 %v1204_v0  ;;  %1072 = vmatprep.subr.bf16.mxu1 %v1276_v54 }
 0x194   : > { %v687_v47 = vpop.permute.xlu0 %686 }
 0x195   : > { %v665_v3 = vsel %vm664_vm9, %v1191_v62, %v1205_v2  ;;  %v667_v4 = vsel %vm664_vm9, %v1206_v1, %v1190_v63  ;;  %v666_v6 = vsel %vm664_vm9, %v1205_v2, %v1206_v1 }
 0x196   : > { %v1061_v7 = vpack.c.bf16 %v665_v3, %v639_v49  ;;  %v1073_v9 = vpack.c.bf16 %v667_v4, %v641_v51  ;;  %v685_v10 = vpop.permute.xlu1 %684  ;;  %v1059_v11 = vpack.c.bf16 %v666_v6, %v640_v5 }
 0x197   : > { %v692_v54 = vsel %vm690_vm10, %v685_v10, %v687_v47 }
 0x198   : > { %1060 = vmatprep.subr.bf16.mxu0 %v1059_v11  ;;  %1074 = vmatpush3.bf16.msra.mxu1 %v1073_v9  ;;  %v683_v12 = vpop.permute.xlu0 %682 }
 0x199   : > { %1062 = vmatpush1.bf16.msra.mxu0 %v1061_v7  ;;  %1026 = vmatprep.subr.mxu1 %v1273_v8  ;;  %v691_v16 = vsel %vm690_vm10, %v683_v12, %v685_v10 }
 0x19a   : > { %v689_v13 = vpop.permute.xlu1 %688  ;;  %754 = vmatprep.subr.mxu0 %v692_v54 }
 0x19b   : > { %v693_v15 = vsel %vm690_vm10, %v687_v47, %v689_v13 }
 0x19c   : > { %1027 = vmatpush3.msra.mxu1 %v693_v15 }
 0x19d   : > { %755 = vmatpush1.msra.mxu0 %v691_v16  ;;  %1029 = vmatmul.mubr.msk.f32.vlgmr.msra.gmra.mrb[2].mxu1 %vm734_vm11, %v700_v14 }
 0x19e   : > { %975 = vmatmul.mubr.msk.f32.vlgmr.msra.gmra.mrb[2].mxu0 %vm734_vm11, %v700_v14 }
 0x1a9   : > { %v732_v17 = vpop.permute.xlu0 %731 }
 0x1ab   : > { %v478_v18 = vpop.permute.xlu1 %477 }
 0x1ac   : > { %v1075_v19 = vadd.f32 %v732_v17, %v478_v18  ;;  %v482_v8 = vadd.f32 %v1416_v37, %v478_v18 }
 0x270   : > { %v875_v20 = vpop.f32.mrb[2].mxu1 }
 0x271   : > { %v876_v21 = vadd.f32 %v875_v20, %v732_v17  ;;  %v804_v22 = vpop.f32.mrb[2].mxu0  ;;  %v1030_v23 = vpop.f32.mrb[3].mxu1 }
 0x272   : > { %v1076_v24 = vadd.f32 %v1075_v19, %v804_v22  ;;  %v806_v25 = vpop.f32.mrb[3].mxu0 }
 0x273   : > { %v881_v26 = vadd.f32 %v876_v21, %v482_v8  ;;  %v1078_v27 = vadd.f32 %v1075_v19, %v806_v25 }
 0x274   : > { %v882_v28 = vmax.f32 %v1076_v24, 0.0 }
 0x275   : > { %v884_v29 = vmax.f32 %v881_v26, 0.0  ;;  %v883_v30 = vmax.f32 %v1078_v27, 0.0 }
 0x276   : > { %885 = vst [vmem:[%s1379_s16] sm:$0xff] %v882_v28 }
 0x277   : > { %887 = vst [vmem:[%s1379_s16 + $0x10] sm:$0xff] %v884_v29  ;;  %886 = vst [vmem:[%s1379_s16 + $0x8] sm:$0xff] %v883_v30 }
 0x278   : > { %1221 = shalt.err (!%p1218_p4)
}
 0x279   : > { %s1222_s9 = scalar_lea.hbm %s1472_s17, 384  ;;  %s1226_s29 = scalar_lea.hbm %s1525_s6, 768 }
 0x27a   : > { %p1223_p7 = scmp.ne.s32.totalorder %s1472_s17, %s1222_s9  ;;  %p1227_p10 = scmp.lt.u32.totalorder %s1472_s17, %s1525_s6 }
 0x27b   : > { %p1228_p11 = scmp.lt.u32.totalorder %s1226_s29, %s1222_s9  ;;  %p1230_p13 = scmp.lt.u32.totalorder %s1222_s9, %s1472_s17 }
 0x27c   : > { %p1224_p8 = pnand %p1223_p7, %p1359_p5 }
 0x27d   : > { %p1229_p12 = por %p1228_p11, %p1227_p10 }
 0x27e   : > { %p1225_p9 = pneg %p1224_p8 }
 0x27f   : > { %p1231_p0 = por %p1230_p13, %p1229_p12 }
 0x281   : > { %p1232_p1 = pnand %p1231_p0, %p1225_p9 }
 0x283   : > { %1235 = shalt.err (!%p1232_p1)
}
 0x284   : > { %1084 = dma.vmem_to_hbm [thread:$0]  (%p1359_p5), %s1474_s13, 384, %s1472_s17, %s889_s25  }
 0x285 PF: > { %p1090_p2 = scmp.ge.s32.totalorder %s1270_s24, 2  ;;  %s915_s12 = sand.u32 1, %s1258_s21  }
 0x286   : > { %s916_s14 = scalar_lea.sflag [#allocation5], %s915_s12 }
 0x287   : > { %p1087_p3 = pnand %p1090_p2, %p1363_p6 }
 0x289   : > { %1253 = dma.done.wait (!%p1087_p3), %s916_s14, 384  }
 0x28a   : > { %1255 = vsyncadd (!%p1087_p3), %s916_s14, 4294966912  ;;  %p16_p4 = scmp.ge.s32.totalorder %s1346_s27, 4   ;;  %s1528_s21 = smov %s1262_s22 }
 0x28b   : > { %s1529_s22 = smov %s1266_s23  ;;  %s1530_s23 = smov %s1357_s30 }
 0x28c   : > { %s1531_s24 = smov %s1346_s27  ;;  %18 = sbr.rel (!%p16_p4) target bundleno = 3 (0x3), region = 83 }
 0x293   :  { %921 = vsyncpa [#allocation5], 1 }
 0x294   :  { %923 = vsyncpa [#allocation5 + $0x1], 1 }

</bundles_post_ra>
